<compile_context>
chip_gen: v6e
topology: v6e:2x2x1
jax: 0.10.0
libtpu: 0.0.40
codegen_flags: <defaults>
</compile_context>

<pallas_src>
import functools

import jax
import jax.numpy as jnp
from jax import lax
from jax.experimental import pallas as pl
from jax.experimental.pallas import tpu as pltpu


# ---------------------------------------------------------------------------
# Pass 1: conv (9 accumulating MXU taps, built in-kernel from 3 column slabs)
#         + bias + ReLU, plus per-image per-channel [sum, centered sum-of-squares].
# Layout per image: (C_out, H_out*W_out) -- C_out on sublanes, flattened spatial on lanes.
# ---------------------------------------------------------------------------
def _conv_relu_stats_kernel(e0_ref, od_ref, e1_ref, w_ref, b_ref,
                            y_ref, s1_ref, m2_ref, *, w_out, hw):
    acc = None
    for s, slab in enumerate((e0_ref, od_ref, e1_ref)):        # column taps kw = 0, 1, 2
        for kh in range(3):                                     # row taps (in-kernel)
            # Contiguous lane window of length HW starting at kh*W_out: row shift by kh.
            tap = slab[0, :, kh * w_out: kh * w_out + hw]       # (C_in, HW)
            w_t = w_ref[s * 3 + kh]                             # (C_out, C_in)
            d = lax.dot_general(w_t, tap, (((1,), (0,)), ((), ())),
                                preferred_element_type=jnp.float32)
            acc = d if acc is None else acc + d
    y = jnp.maximum(acc + b_ref[...], 0.0)                      # bias + ReLU, (C_out, HW)
    y_ref[0] = y                                                # lane-dense store

    # Per-image BN partials: sum and CENTERED sum of squares (cancellation-safe).
    s1 = jnp.sum(y, axis=1, keepdims=True)                      # (C_out, 1)
    d0 = y - s1 * (1.0 / hw)
    s1_ref[0] = s1
    m2_ref[0] = jnp.sum(d0 * d0, axis=1, keepdims=True)         # (C_out, 1)


# ---------------------------------------------------------------------------
# Pass 2: BatchNorm apply -- pure FMA with wrapper-precomputed scale/shift,
#         written in place on the y buffer (input_output_aliases).
# ---------------------------------------------------------------------------
def _bn_apply_kernel(y_ref, scale_ref, shift_ref, o_ref):
    o_ref[0] = y_ref[0] * scale_ref[...] + shift_ref[...]


def _default_encoder_impl(x_nchw, w_oihw, bias, gamma, beta):
    """Forward pass matching the PyTorch DefaultEncoder (NCHW in, NCHW out)."""
    N, C_in, H, W = x_nchw.shape
    C_out = w_oihw.shape[0]
    H_out = H                                   # pad (1,1), k=3, stride 1 on height
    W_out = (W - 1) // 2 + 1                    # pad (1,1), k=3, stride 2 on width
    HW = H_out * W_out
    HP = H_out + 2                              # padded row count
    L = HP * W_out                              # flattened slab row length
    eps = 1e-5

    # ---- wrapper-side layout plumbing (fused by XLA under jit; ~1.5x input, not 4.5x) ----
    x = x_nchw.astype(jnp.float32)
    x_pad = jnp.pad(x, ((0, 0), (0, 0), (1, 1), (1, 1)))          # (N, C_in, H+2, W+2)
    # Column taps under stride 2: output col w reads padded cols 2w, 2w+1, 2w+2.
    e0 = x_pad[:, :, :, 0:2 * W_out:2].reshape(N, C_in, L)        # kw = 0
    od = x_pad[:, :, :, 1:2 * W_out:2].reshape(N, C_in, L)        # kw = 1
    e1 = x_pad[:, :, :, 2:2 * W_out + 1:2].reshape(N, C_in, L)    # kw = 2

    # w9[kw*3 + kh] = weight[:, :, kh, kw] as (C_out, C_in)
    w9 = jnp.transpose(w_oihw, (3, 2, 0, 1)).reshape(9, C_out, C_in).astype(jnp.float32)
    b2 = bias.reshape(C_out, 1).astype(jnp.float32)

    # VMEM budget from the actual per-step footprint (double-buffered, with headroom),
    # capped at the v7x scoped default (64 MiB physical / 32 MiB scoped).
    p1_step = 4 * (3 * C_in * L + 9 * C_out * C_in + C_out + C_out * HW + 2 * C_out)
    p2_step = 4 * (2 * C_out * HW + 2 * C_out)
    vmem_limit = int(min(max(4 * max(p1_step, p2_step), 16 << 20), 32 << 20))
    # TODO(synk): on v7x try pltpu.CORE_PARALLEL for the image axis (per-image outputs are
    # already race-free); "parallel" is kept here as the portable/safe choice.
    cparams = pltpu.CompilerParams(
        dimension_semantics=("parallel",),
        vmem_limit_bytes=vmem_limit,
    )

    img_spec = pl.BlockSpec((1, C_in, L), lambda n: (n, 0, 0))
    y_spec = pl.BlockSpec((1, C_out, HW), lambda n: (n, 0, 0))
    vec_spec = pl.BlockSpec((1, C_out, 1), lambda n: (n, 0, 0))
    chan_spec = pl.BlockSpec((C_out, 1), lambda n: (0, 0))

    # ---- pass 1: conv + bias + ReLU + per-image BN partial stats ----
    y_flat, s1, m2 = pl.pallas_call(
        functools.partial(_conv_relu_stats_kernel, w_out=W_out, hw=HW),
        out_shape=(
            jax.ShapeDtypeStruct((N, C_out, HW), jnp.float32),
            jax.ShapeDtypeStruct((N, C_out, 1), jnp.float32),
            jax.ShapeDtypeStruct((N, C_out, 1), jnp.float32),
        ),
        grid=(N,),
        in_specs=[
            img_spec, img_spec, img_spec,                         # 3 column-tap slabs
            pl.BlockSpec((9, C_out, C_in), lambda n: (0, 0, 0)),  # per-tap weights
            chan_spec,                                            # bias
        ],
        out_specs=(y_spec, vec_spec, vec_spec),
        compiler_params=cparams,
        cost_estimate=pl.CostEstimate(
            flops=2 * N * HW * 9 * C_in * C_out,
            transcendentals=0,
            bytes_accessed=4 * (3 * N * C_in * L + 9 * C_out * C_in + C_out
                                + N * C_out * (HW + 2)),
        ),
    )(e0, od, e1, w9, b2)

    # Tiny Chan-style cross-image combine -> global batch statistics (biased variance),
    # then precompute scale/shift so pass 2 is a pure FMA.
    count = float(N * HW)
    s1 = s1[:, :, 0]                                              # (N, C_out)
    m2 = m2[:, :, 0]
    mean = jnp.sum(s1, axis=0) / count                            # (C_out,)
    mean_img = s1 * (1.0 / HW)                                    # per-image means
    between = HW * jnp.sum((mean_img - mean[None, :]) ** 2, axis=0)
    var = jnp.maximum((jnp.sum(m2, axis=0) + between) / count, 0.0)
    scale_vec = gamma.astype(jnp.float32) * lax.rsqrt(var + eps)  # (C_out,)
    shift_vec = beta.astype(jnp.float32) - mean * scale_vec
    scale2 = scale_vec.reshape(C_out, 1)
    shift2 = shift_vec.reshape(C_out, 1)

    # ---- pass 2: BatchNorm apply (in place on the y buffer) ----
    out_flat = pl.pallas_call(
        _bn_apply_kernel,
        out_shape=jax.ShapeDtypeStruct((N, C_out, HW), jnp.float32),
        grid=(N,),
        in_specs=[y_spec, chan_spec, chan_spec],
        out_specs=y_spec,
        input_output_aliases={0: 0},
        compiler_params=cparams,
        cost_estimate=pl.CostEstimate(
            flops=2 * N * C_out * HW, transcendentals=0,
            bytes_accessed=4 * (2 * N * C_out * HW + 2 * C_out)),
    )(y_flat, scale2, shift2)

    # TODO(synk): BatchNorm2d running_mean/running_var buffer updates (training-time side
    # effect) are not materialized; the forward output does not depend on them.
    return out_flat.reshape(N, C_out, H_out, W_out)               # free contiguous reshape


default_encoder = jax.jit(_default_encoder_impl)


def _reference(x_nchw, w_oihw, bias, gamma, beta):
    """Pure-JAX mirror of the PyTorch forward (for correctness checking)."""
    y = lax.conv_general_dilated(
        x_nchw, w_oihw, window_strides=(1, 2), padding=((1, 1), (1, 1)),
        dimension_numbers=("NCHW", "OIHW", "NCHW"))
    y = jnp.maximum(y + bias[None, :, None, None], 0.0)
    m = jnp.mean(y, axis=(0, 2, 3), keepdims=True)
    v = jnp.mean((y - m) ** 2, axis=(0, 2, 3), keepdims=True)
    return (y - m) / jnp.sqrt(v + 1e-5) * gamma[None, :, None, None] \
        + beta[None, :, None, None]


if __name__ == "__main__":
    N, C_in, H, W = 2, 4, 16, 16
    filter_size = 8

    key = jax.random.PRNGKey(0)
    kx, kw, kb = jax.random.split(key, 3)
    x = jax.random.normal(kx, (N, C_in, H, W), dtype=jnp.float32)
    # Deterministic synthetic parameters (shapes from the module's __init__).
    w_oihw = 0.1 * jax.random.normal(kw, (filter_size, C_in, 3, 3), dtype=jnp.float32)
    bias = 0.05 * jax.random.normal(kb, (filter_size,), dtype=jnp.float32)
    gamma = jnp.ones((filter_size,), jnp.float32)    # BatchNorm2d default weight
    beta = jnp.zeros((filter_size,), jnp.float32)    # BatchNorm2d default bias

    out = default_encoder(x, w_oihw, bias, gamma, beta)
    out = jax.block_until_ready(out)

    ref = _reference(x, w_oihw, bias, gamma, beta)
    W_out = (W - 1) // 2 + 1
    assert out.shape == (N, filter_size, H, W_out)
    assert jnp.allclose(out, ref, rtol=2e-4, atol=2e-4), "mismatch vs reference"

    print("KERNEL_OK")
</pallas_src>

<mosaic_0001>
module attributes {stable_mosaic.version = 11 : i64} {
  func.func @_conv_relu_stats_kernel(%arg0: i32, %arg1: memref<1x4x144xf32, #tpu.memory_space<vmem>>, %arg2: memref<1x4x144xf32, #tpu.memory_space<vmem>>, %arg3: memref<1x4x144xf32, #tpu.memory_space<vmem>>, %arg4: memref<9x8x4xf32, #tpu.memory_space<vmem>>, %arg5: memref<8x1xf32, #tpu.memory_space<vmem>>, %arg6: memref<1x8x128xf32, #tpu.memory_space<vmem>>, %arg7: memref<1x8x1xf32, #tpu.memory_space<vmem>>, %arg8: memref<1x8x1xf32, #tpu.memory_space<vmem>>) attributes {dimension_semantics = [#tpu.dimension_semantics<parallel>], iteration_bounds = array<i64: 2>, scalar_prefetch = 0 : i64, scratch_operands = 0 : i64, tpu.core_type = #tpu.core_type<tc>, window_params = [{transform_indices = @transform_0, window_bounds = array<i64: 1, 4, 144>}, {transform_indices = @transform_1, window_bounds = array<i64: 1, 4, 144>}, {transform_indices = @transform_2, window_bounds = array<i64: 1, 4, 144>}, {pipeline_mode = #tpu.pipeline_mode<synchronous>, transform_indices = @transform_3, window_bounds = array<i64: 9, 8, 4>}, {pipeline_mode = #tpu.pipeline_mode<synchronous>, transform_indices = @transform_4, window_bounds = array<i64: 8, 1>}, {transform_indices = @transform_5, window_bounds = array<i64: 1, 8, 128>}, {transform_indices = @transform_6, window_bounds = array<i64: 1, 8, 1>}, {transform_indices = @transform_7, window_bounds = array<i64: 1, 8, 1>}]} {
    %c0 = arith.constant 0 : index
    %c0_0 = arith.constant 0 : index
    %c0_1 = arith.constant 0 : index
    %0 = vector.load %arg1[%c0, %c0_0, %c0_1] : memref<1x4x144xf32, #tpu.memory_space<vmem>>, vector<1x4x128xf32>
    %1 = vector.shape_cast %0 : vector<1x4x128xf32> to vector<4x128xf32>
    %c0_2 = arith.constant 0 : index
    %c0_3 = arith.constant 0 : index
    %c0_4 = arith.constant 0 : index
    %2 = vector.load %arg4[%c0_2, %c0_3, %c0_4] : memref<9x8x4xf32, #tpu.memory_space<vmem>>, vector<1x8x4xf32>
    %3 = vector.shape_cast %2 : vector<1x8x4xf32> to vector<8x4xf32>
    %cst = arith.constant dense<0.000000e+00> : vector<8x128xf32>
    %4 = tpu.matmul %3, %1, %cst {dimension_numbers = #tpu.dot_dimension_numbers<[1], [0], [0], [1], [0, 0, 1, 1], [], []>} : vector<8x4xf32>, vector<4x128xf32>, vector<8x128xf32> -> vector<8x128xf32>
    %c0_5 = arith.constant 0 : index
    %c0_6 = arith.constant 0 : index
    %c8 = arith.constant 8 : index
    %5 = vector.load %arg1[%c0_5, %c0_6, %c8] : memref<1x4x144xf32, #tpu.memory_space<vmem>>, vector<1x4x128xf32>
    %6 = vector.shape_cast %5 : vector<1x4x128xf32> to vector<4x128xf32>
    %c1 = arith.constant 1 : index
    %c0_7 = arith.constant 0 : index
    %c0_8 = arith.constant 0 : index
    %7 = vector.load %arg4[%c1, %c0_7, %c0_8] : memref<9x8x4xf32, #tpu.memory_space<vmem>>, vector<1x8x4xf32>
    %8 = vector.shape_cast %7 : vector<1x8x4xf32> to vector<8x4xf32>
    %cst_9 = arith.constant dense<0.000000e+00> : vector<8x128xf32>
    %9 = tpu.matmul %8, %6, %cst_9 {dimension_numbers = #tpu.dot_dimension_numbers<[1], [0], [0], [1], [0, 0, 1, 1], [], []>} : vector<8x4xf32>, vector<4x128xf32>, vector<8x128xf32> -> vector<8x128xf32>
    %10 = arith.addf %4, %9 : vector<8x128xf32>
    %c0_10 = arith.constant 0 : index
    %c0_11 = arith.constant 0 : index
    %c16 = arith.constant 16 : index
    %11 = vector.load %arg1[%c0_10, %c0_11, %c16] : memref<1x4x144xf32, #tpu.memory_space<vmem>>, vector<1x4x128xf32>
    %12 = vector.shape_cast %11 : vector<1x4x128xf32> to vector<4x128xf32>
    %c2 = arith.constant 2 : index
    %c0_12 = arith.constant 0 : index
    %c0_13 = arith.constant 0 : index
    %13 = vector.load %arg4[%c2, %c0_12, %c0_13] : memref<9x8x4xf32, #tpu.memory_space<vmem>>, vector<1x8x4xf32>
    %14 = vector.shape_cast %13 : vector<1x8x4xf32> to vector<8x4xf32>
    %cst_14 = arith.constant dense<0.000000e+00> : vector<8x128xf32>
    %15 = tpu.matmul %14, %12, %cst_14 {dimension_numbers = #tpu.dot_dimension_numbers<[1], [0], [0], [1], [0, 0, 1, 1], [], []>} : vector<8x4xf32>, vector<4x128xf32>, vector<8x128xf32> -> vector<8x128xf32>
    %16 = arith.addf %10, %15 : vector<8x128xf32>
    %c0_15 = arith.constant 0 : index
    %c0_16 = arith.constant 0 : index
    %c0_17 = arith.constant 0 : index
    %17 = vector.load %arg2[%c0_15, %c0_16, %c0_17] : memref<1x4x144xf32, #tpu.memory_space<vmem>>, vector<1x4x128xf32>
    %18 = vector.shape_cast %17 : vector<1x4x128xf32> to vector<4x128xf32>
    %c3 = arith.constant 3 : index
    %c0_18 = arith.constant 0 : index
    %c0_19 = arith.constant 0 : index
    %19 = vector.load %arg4[%c3, %c0_18, %c0_19] : memref<9x8x4xf32, #tpu.memory_space<vmem>>, vector<1x8x4xf32>
    %20 = vector.shape_cast %19 : vector<1x8x4xf32> to vector<8x4xf32>
    %cst_20 = arith.constant dense<0.000000e+00> : vector<8x128xf32>
    %21 = tpu.matmul %20, %18, %cst_20 {dimension_numbers = #tpu.dot_dimension_numbers<[1], [0], [0], [1], [0, 0, 1, 1], [], []>} : vector<8x4xf32>, vector<4x128xf32>, vector<8x128xf32> -> vector<8x128xf32>
    %22 = arith.addf %16, %21 : vector<8x128xf32>
    %c0_21 = arith.constant 0 : index
    %c0_22 = arith.constant 0 : index
    %c8_23 = arith.constant 8 : index
    %23 = vector.load %arg2[%c0_21, %c0_22, %c8_23] : memref<1x4x144xf32, #tpu.memory_space<vmem>>, vector<1x4x128xf32>
    %24 = vector.shape_cast %23 : vector<1x4x128xf32> to vector<4x128xf32>
    %c4 = arith.constant 4 : index
    %c0_24 = arith.constant 0 : index
    %c0_25 = arith.constant 0 : index
    %25 = vector.load %arg4[%c4, %c0_24, %c0_25] : memref<9x8x4xf32, #tpu.memory_space<vmem>>, vector<1x8x4xf32>
    %26 = vector.shape_cast %25 : vector<1x8x4xf32> to vector<8x4xf32>
    %cst_26 = arith.constant dense<0.000000e+00> : vector<8x128xf32>
    %27 = tpu.matmul %26, %24, %cst_26 {dimension_numbers = #tpu.dot_dimension_numbers<[1], [0], [0], [1], [0, 0, 1, 1], [], []>} : vector<8x4xf32>, vector<4x128xf32>, vector<8x128xf32> -> vector<8x128xf32>
    %28 = arith.addf %22, %27 : vector<8x128xf32>
    %c0_27 = arith.constant 0 : index
    %c0_28 = arith.constant 0 : index
    %c16_29 = arith.constant 16 : index
    %29 = vector.load %arg2[%c0_27, %c0_28, %c16_29] : memref<1x4x144xf32, #tpu.memory_space<vmem>>, vector<1x4x128xf32>
    %30 = vector.shape_cast %29 : vector<1x4x128xf32> to vector<4x128xf32>
    %c5 = arith.constant 5 : index
    %c0_30 = arith.constant 0 : index
    %c0_31 = arith.constant 0 : index
    %31 = vector.load %arg4[%c5, %c0_30, %c0_31] : memref<9x8x4xf32, #tpu.memory_space<vmem>>, vector<1x8x4xf32>
    %32 = vector.shape_cast %31 : vector<1x8x4xf32> to vector<8x4xf32>
    %cst_32 = arith.constant dense<0.000000e+00> : vector<8x128xf32>
    %33 = tpu.matmul %32, %30, %cst_32 {dimension_numbers = #tpu.dot_dimension_numbers<[1], [0], [0], [1], [0, 0, 1, 1], [], []>} : vector<8x4xf32>, vector<4x128xf32>, vector<8x128xf32> -> vector<8x128xf32>
    %34 = arith.addf %28, %33 : vector<8x128xf32>
    %c0_33 = arith.constant 0 : index
    %c0_34 = arith.constant 0 : index
    %c0_35 = arith.constant 0 : index
    %35 = vector.load %arg3[%c0_33, %c0_34, %c0_35] : memref<1x4x144xf32, #tpu.memory_space<vmem>>, vector<1x4x128xf32>
    %36 = vector.shape_cast %35 : vector<1x4x128xf32> to vector<4x128xf32>
    %c6 = arith.constant 6 : index
    %c0_36 = arith.constant 0 : index
    %c0_37 = arith.constant 0 : index
    %37 = vector.load %arg4[%c6, %c0_36, %c0_37] : memref<9x8x4xf32, #tpu.memory_space<vmem>>, vector<1x8x4xf32>
    %38 = vector.shape_cast %37 : vector<1x8x4xf32> to vector<8x4xf32>
    %cst_38 = arith.constant dense<0.000000e+00> : vector<8x128xf32>
    %39 = tpu.matmul %38, %36, %cst_38 {dimension_numbers = #tpu.dot_dimension_numbers<[1], [0], [0], [1], [0, 0, 1, 1], [], []>} : vector<8x4xf32>, vector<4x128xf32>, vector<8x128xf32> -> vector<8x128xf32>
    %40 = arith.addf %34, %39 : vector<8x128xf32>
    %c0_39 = arith.constant 0 : index
    %c0_40 = arith.constant 0 : index
    %c8_41 = arith.constant 8 : index
    %41 = vector.load %arg3[%c0_39, %c0_40, %c8_41] : memref<1x4x144xf32, #tpu.memory_space<vmem>>, vector<1x4x128xf32>
    %42 = vector.shape_cast %41 : vector<1x4x128xf32> to vector<4x128xf32>
    %c7 = arith.constant 7 : index
    %c0_42 = arith.constant 0 : index
    %c0_43 = arith.constant 0 : index
    %43 = vector.load %arg4[%c7, %c0_42, %c0_43] : memref<9x8x4xf32, #tpu.memory_space<vmem>>, vector<1x8x4xf32>
    %44 = vector.shape_cast %43 : vector<1x8x4xf32> to vector<8x4xf32>
    %cst_44 = arith.constant dense<0.000000e+00> : vector<8x128xf32>
    %45 = tpu.matmul %44, %42, %cst_44 {dimension_numbers = #tpu.dot_dimension_numbers<[1], [0], [0], [1], [0, 0, 1, 1], [], []>} : vector<8x4xf32>, vector<4x128xf32>, vector<8x128xf32> -> vector<8x128xf32>
    %46 = arith.addf %40, %45 : vector<8x128xf32>
    %c0_45 = arith.constant 0 : index
    %c0_46 = arith.constant 0 : index
    %c16_47 = arith.constant 16 : index
    %47 = vector.load %arg3[%c0_45, %c0_46, %c16_47] : memref<1x4x144xf32, #tpu.memory_space<vmem>>, vector<1x4x128xf32>
    %48 = vector.shape_cast %47 : vector<1x4x128xf32> to vector<4x128xf32>
    %c8_48 = arith.constant 8 : index
    %c0_49 = arith.constant 0 : index
    %c0_50 = arith.constant 0 : index
    %49 = vector.load %arg4[%c8_48, %c0_49, %c0_50] : memref<9x8x4xf32, #tpu.memory_space<vmem>>, vector<1x8x4xf32>
    %50 = vector.shape_cast %49 : vector<1x8x4xf32> to vector<8x4xf32>
    %cst_51 = arith.constant dense<0.000000e+00> : vector<8x128xf32>
    %51 = tpu.matmul %50, %48, %cst_51 {dimension_numbers = #tpu.dot_dimension_numbers<[1], [0], [0], [1], [0, 0, 1, 1], [], []>} : vector<8x4xf32>, vector<4x128xf32>, vector<8x128xf32> -> vector<8x128xf32>
    %52 = arith.addf %46, %51 : vector<8x128xf32>
    %c0_52 = arith.constant 0 : index
    %c0_53 = arith.constant 0 : index
    %53 = vector.load %arg5[%c0_52, %c0_53] : memref<8x1xf32, #tpu.memory_space<vmem>>, vector<8x1xf32>
    %54 = vector.broadcast %53 : vector<8x1xf32> to vector<8x128xf32>
    %55 = arith.addf %52, %54 : vector<8x128xf32>
    %cst_54 = arith.constant 0.000000e+00 : f32
    %56 = vector.broadcast %cst_54 : f32 to vector<8x128xf32>
    %57 = arith.maximumf %55, %56 : vector<8x128xf32>
    %c0_55 = arith.constant 0 : index
    %c0_56 = arith.constant 0 : index
    %c0_57 = arith.constant 0 : index
    %58 = vector.load %arg6[%c0_55, %c0_56, %c0_57] : memref<1x8x128xf32, #tpu.memory_space<vmem>>, vector<1x8x128xf32>
    %59 = vector.shape_cast %58 : vector<1x8x128xf32> to vector<8x128xf32>
    %60 = vector.shape_cast %57 : vector<8x128xf32> to vector<1x8x128xf32>
    tpu.vector_store %arg6[%c0_55, %c0_56, %c0_57], %60 {strides = array<i32>} : memref<1x8x128xf32, #tpu.memory_space<vmem>>, vector<1x8x128xf32>,
    %cst_58 = arith.constant dense<0.000000e+00> : vector<8xf32>
    %61 = vector.multi_reduction <add>, %57, %cst_58 [1] : vector<8x128xf32> to vector<8xf32>
    %62 = vector.shape_cast %61 : vector<8xf32> to vector<8x1xf32>
    %cst_59 = arith.constant 7.812500e-03 : f32
    %63 = vector.broadcast %cst_59 : f32 to vector<8x1xf32>
    %64 = arith.mulf %62, %63 : vector<8x1xf32>
    %65 = vector.broadcast %64 : vector<8x1xf32> to vector<8x128xf32>
    %66 = arith.subf %57, %65 : vector<8x128xf32>
    %c0_60 = arith.constant 0 : index
    %c0_61 = arith.constant 0 : index
    %c0_62 = arith.constant 0 : index
    %67 = vector.load %arg7[%c0_60, %c0_61, %c0_62] : memref<1x8x1xf32, #tpu.memory_space<vmem>>, vector<1x8x1xf32>
    %68 = vector.shape_cast %67 : vector<1x8x1xf32> to vector<8x1xf32>
    %69 = vector.shape_cast %62 : vector<8x1xf32> to vector<1x8x1xf32>
    tpu.vector_store %arg7[%c0_60, %c0_61, %c0_62], %69 {strides = array<i32>} : memref<1x8x1xf32, #tpu.memory_space<vmem>>, vector<1x8x1xf32>,
    %70 = arith.mulf %66, %66 : vector<8x128xf32>
    %cst_63 = arith.constant dense<0.000000e+00> : vector<8xf32>
    %71 = vector.multi_reduction <add>, %70, %cst_63 [1] : vector<8x128xf32> to vector<8xf32>
    %72 = vector.shape_cast %71 : vector<8xf32> to vector<8x1xf32>
    %c0_64 = arith.constant 0 : index
    %c0_65 = arith.constant 0 : index
    %c0_66 = arith.constant 0 : index
    %73 = vector.load %arg8[%c0_64, %c0_65, %c0_66] : memref<1x8x1xf32, #tpu.memory_space<vmem>>, vector<1x8x1xf32>
    %74 = vector.shape_cast %73 : vector<1x8x1xf32> to vector<8x1xf32>
    %75 = vector.shape_cast %72 : vector<8x1xf32> to vector<1x8x1xf32>
    tpu.vector_store %arg8[%c0_64, %c0_65, %c0_66], %75 {strides = array<i32>} : memref<1x8x1xf32, #tpu.memory_space<vmem>>, vector<1x8x1xf32>,
    return
  }
  func.func @transform_0(%arg0: i32) -> (i32, i32, i32) {
    %c0_i32 = arith.constant 0 : i32
    %c0_i32_0 = arith.constant 0 : i32
    %c0_i32_1 = arith.constant 0 : i32
    return %arg0, %c0_i32, %c0_i32_0 : i32, i32, i32
  }
  func.func @transform_1(%arg0: i32) -> (i32, i32, i32) {
    %c0_i32 = arith.constant 0 : i32
    %c0_i32_0 = arith.constant 0 : i32
    %c0_i32_1 = arith.constant 0 : i32
    return %arg0, %c0_i32, %c0_i32_0 : i32, i32, i32
  }
  func.func @transform_2(%arg0: i32) -> (i32, i32, i32) {
    %c0_i32 = arith.constant 0 : i32
    %c0_i32_0 = arith.constant 0 : i32
    %c0_i32_1 = arith.constant 0 : i32
    return %arg0, %c0_i32, %c0_i32_0 : i32, i32, i32
  }
  func.func @transform_3(%arg0: i32) -> (i32, i32, i32) {
    %c0_i32 = arith.constant 0 : i32
    %c0_i32_0 = arith.constant 0 : i32
    %c0_i32_1 = arith.constant 0 : i32
    %c0_i32_2 = arith.constant 0 : i32
    return %c0_i32, %c0_i32_0, %c0_i32_1 : i32, i32, i32
  }
  func.func @transform_4(%arg0: i32) -> (i32, i32) {
    %c0_i32 = arith.constant 0 : i32
    %c0_i32_0 = arith.constant 0 : i32
    %c0_i32_1 = arith.constant 0 : i32
    return %c0_i32, %c0_i32_0 : i32, i32
  }
  func.func @transform_5(%arg0: i32) -> (i32, i32, i32) {
    %c0_i32 = arith.constant 0 : i32
    %c0_i32_0 = arith.constant 0 : i32
    %c0_i32_1 = arith.constant 0 : i32
    return %arg0, %c0_i32, %c0_i32_0 : i32, i32, i32
  }
  func.func @transform_6(%arg0: i32) -> (i32, i32, i32) {
    %c0_i32 = arith.constant 0 : i32
    %c0_i32_0 = arith.constant 0 : i32
    %c0_i32_1 = arith.constant 0 : i32
    return %arg0, %c0_i32, %c0_i32_0 : i32, i32, i32
  }
  func.func @transform_7(%arg0: i32) -> (i32, i32, i32) {
    %c0_i32 = arith.constant 0 : i32
    %c0_i32_0 = arith.constant 0 : i32
    %c0_i32_1 = arith.constant 0 : i32
    return %arg0, %c0_i32, %c0_i32_0 : i32, i32, i32
  }
}

module attributes {stable_mosaic.version = 11 : i64} {
  func.func @_bn_apply_kernel(%arg0: i32, %arg1: memref<1x8x128xf32, #tpu.memory_space<vmem>>, %arg2: memref<8x1xf32, #tpu.memory_space<vmem>>, %arg3: memref<8x1xf32, #tpu.memory_space<vmem>>, %arg4: memref<1x8x128xf32, #tpu.memory_space<vmem>>) attributes {dimension_semantics = [#tpu.dimension_semantics<parallel>], iteration_bounds = array<i64: 2>, scalar_prefetch = 0 : i64, scratch_operands = 0 : i64, tpu.core_type = #tpu.core_type<tc>, window_params = [{transform_indices = @transform_0, window_bounds = array<i64: 1, 8, 128>}, {pipeline_mode = #tpu.pipeline_mode<synchronous>, transform_indices = @transform_1, window_bounds = array<i64: 8, 1>}, {pipeline_mode = #tpu.pipeline_mode<synchronous>, transform_indices = @transform_2, window_bounds = array<i64: 8, 1>}, {transform_indices = @transform_3, window_bounds = array<i64: 1, 8, 128>}]} {
    %c0 = arith.constant 0 : index
    %c0_0 = arith.constant 0 : index
    %c0_1 = arith.constant 0 : index
    %0 = vector.load %arg1[%c0, %c0_0, %c0_1] : memref<1x8x128xf32, #tpu.memory_space<vmem>>, vector<1x8x128xf32>
    %1 = vector.shape_cast %0 : vector<1x8x128xf32> to vector<8x128xf32>
    %c0_2 = arith.constant 0 : index
    %c0_3 = arith.constant 0 : index
    %2 = vector.load %arg2[%c0_2, %c0_3] : memref<8x1xf32, #tpu.memory_space<vmem>>, vector<8x1xf32>
    %3 = vector.broadcast %2 : vector<8x1xf32> to vector<8x128xf32>
    %4 = arith.mulf %1, %3 : vector<8x128xf32>
    %c0_4 = arith.constant 0 : index
    %c0_5 = arith.constant 0 : index
    %5 = vector.load %arg3[%c0_4, %c0_5] : memref<8x1xf32, #tpu.memory_space<vmem>>, vector<8x1xf32>
    %6 = vector.broadcast %5 : vector<8x1xf32> to vector<8x128xf32>
    %7 = arith.addf %4, %6 : vector<8x128xf32>
    %c0_6 = arith.constant 0 : index
    %c0_7 = arith.constant 0 : index
    %c0_8 = arith.constant 0 : index
    %8 = vector.load %arg4[%c0_6, %c0_7, %c0_8] : memref<1x8x128xf32, #tpu.memory_space<vmem>>, vector<1x8x128xf32>
    %9 = vector.shape_cast %8 : vector<1x8x128xf32> to vector<8x128xf32>
    %10 = vector.shape_cast %7 : vector<8x128xf32> to vector<1x8x128xf32>
    tpu.vector_store %arg4[%c0_6, %c0_7, %c0_8], %10 {strides = array<i32>} : memref<1x8x128xf32, #tpu.memory_space<vmem>>, vector<1x8x128xf32>,
    return
  }
  func.func @transform_0(%arg0: i32) -> (i32, i32, i32) {
    %c0_i32 = arith.constant 0 : i32
    %c0_i32_0 = arith.constant 0 : i32
    %c0_i32_1 = arith.constant 0 : i32
    return %arg0, %c0_i32, %c0_i32_0 : i32, i32, i32
  }
  func.func @transform_1(%arg0: i32) -> (i32, i32) {
    %c0_i32 = arith.constant 0 : i32
    %c0_i32_0 = arith.constant 0 : i32
    %c0_i32_1 = arith.constant 0 : i32
    return %c0_i32, %c0_i32_0 : i32, i32
  }
  func.func @transform_2(%arg0: i32) -> (i32, i32) {
    %c0_i32 = arith.constant 0 : i32
    %c0_i32_0 = arith.constant 0 : i32
    %c0_i32_1 = arith.constant 0 : i32
    return %c0_i32, %c0_i32_0 : i32, i32
  }
  func.func @transform_3(%arg0: i32) -> (i32, i32, i32) {
    %c0_i32 = arith.constant 0 : i32
    %c0_i32_0 = arith.constant 0 : i32
    %c0_i32_1 = arith.constant 0 : i32
    return %arg0, %c0_i32, %c0_i32_0 : i32, i32, i32
  }
}

</mosaic_0001>

<bundles_post_ra>
// kernel: _default_encoder_impl.3
= control target key start
LH: loop header
LB: loop body
LE: loop exit
PB: predicated region body
PF: predicated region fallthrough
CT: control target
= control target key end

     0   :  { %s283_s12 = smov 0   ;;  %s300_s0 = inlined_call_operand.vmem [shape: f32[2,8,128], index: 0, kind: input, shape index: {}, may-alias: {0,3}]   ;;  %s301_s1 = inlined_call_operand.vmem [shape: f32[8,1], index: 1, kind: input, shape index: {}]   ;;  %s302_s2 = inlined_call_operand.vmem [shape: f32[8,1], index: 2, kind: input, shape index: {}]   ;;  %s303_s3 = inlined_call_operand.vmem [shape: f32[2,8,128], index: 3, kind: output, shape index: {}, may-alias: {0,3}]  }
   0x1 LB: > { %s235_s13 = sadd.s32 4294967295, %s260_s12   ;;  %p239_p0 = scmp.ge.s32.totalorder %s260_s12, 1  ;;  %s260_s12 = sphi %s283_s12, %s13_s12  }
   0x2   : > { %p136_p1 = scmp.lt.s32.totalorder %s260_s12, 3 }
   0x4   : > { %p137_p2 = pnand %p239_p0, %p136_p1 }
   0x5   : > { %p158_p3 = scmp.lt.s32.totalorder (!%p137_p2), %s235_s13, 1 }
   0x6   : > { %140 = sbr.rel (%p137_p2) target bundleno = 144 (0x90), region = 32 }
   0xb   : > { %v167_v0 = vld [vmem:[%s301_s1] sm:$0xff]  ;;  %v262_v1 = vmov 0   ;;  %s305_s13 = smov (!%p158_p3, %s235_s13), 1 }
   0xc   : > { %253 = vset.pattern.permute.xlu0 %v262_v1  ;;  %v174_v2 = vld [vmem:[%s302_s2] sm:$0xff]  ;;  %s240_s18 = sshll.u32 %s305_s13, 3 }
   0xd   : > { %170 = vperm.xlu0 %253, %v167_v0   ;;  %s161_s21 = scalar_lea.vmem %s300_s0, %s240_s18  ;;  %s165_s24 = scalar_lea.vmem %s303_s3, %s240_s18 }
   0xe   : > { %v166_v4 = vld [vmem:[%s161_s21] sm:$0xff] }
  0x11   : > { %177 = vperm.xlu0 %253, %v174_v2  }
  0x88   : > { %v171_v3 = vpop.permute.xlu0 %170 }
  0x89   : > { %v173_v5 = vmul.f32 %v171_v3, %v166_v4 }
  0x8c   : > { %v178_v6 = vpop.permute.xlu0 %177 }
  0x8d   : > { %v180_v7 = vadd.f32 %v178_v6, %v173_v5 }
  0x8f   : > { %181 = vst [vmem:[%s165_s24] sm:$0xff] %v180_v7 }
  0x90 PF: > { %s13_s12 = sadd.s32 1, %s260_s12  }
  0x91   : > { %p10_p4 = scmp.ge.s32.totalorder %s13_s12, 4  }
  0x93   :  { %12 = sbr.rel (!%p10_p4) target bundleno = 1 (0x1), region = 62 }

// kernel: _default_encoder_impl.2
= control target key start
LH: loop header
LB: loop body
LE: loop exit
PB: predicated region body
PF: predicated region fallthrough
CT: control target
= control target key end

     0   :  { %s1431_s24 = smov 0   ;;  %s1559_s0 = inlined_call_operand.vmem [shape: f32[2,4,144], index: 0, kind: input, shape index: {}]   ;;  %s1560_s1 = inlined_call_operand.vmem [shape: f32[2,4,144], index: 1, kind: input, shape index: {}]   ;;  %s1561_s2 = inlined_call_operand.vmem [shape: f32[2,4,144], index: 2, kind: input, shape index: {}]   ;;  %s1562_s3 = inlined_call_operand.vmem [shape: f32[9,8,4], index: 3, kind: input, shape index: {}]   ;;  %s1563_s4 = inlined_call_operand.vmem [shape: f32[8,1], index: 4, kind: input, shape index: {}]   ;;  %s1564_s5 = inlined_call_operand.vmem [shape: f32[2,8,128], index: 5, kind: output, shape index: {0}]   ;;  %s1565_s6 = inlined_call_operand.vmem [shape: f32[2,8,1], index: 6, kind: output, shape index: {1}]   ;;  %s1566_s7 = inlined_call_operand.vmem [shape: f32[2,8,1], index: 7, kind: output, shape index: {2}]  }
   0x1 LB: > { %s1253_s25 = sadd.s32 4294967295, %s1384_s24   ;;  %p1257_p0 = scmp.ge.s32.totalorder %s1384_s24, 1  ;;  %s1384_s24 = sphi %s1431_s24, %s18_s24  }
   0x2   : > { %p262_p1 = scmp.lt.s32.totalorder %s1384_s24, 3 }
   0x4   : > { %p263_p2 = pnand %p1257_p0, %p262_p1 }
   0x5   : > { %p311_p3 = scmp.lt.s32.totalorder (!%p263_p2), %s1253_s25, 1  ;;  %s1388_s12 = smov (!%p263_p2), 112  }
   0x6   : > { %266 = sbr.rel (%p263_p2) target bundleno = 634 (0x27a), region = 40  ;;  %s1389_s13 = smov (!%p263_p2), 120  }
   0xb   : > { %v1386_v0 = vmov 0.0   ;;  %s1568_s25 = smov (!%p311_p3, %s1253_s25), 1  ;;  %vm1387_vm0 = vmmov 0   ;;  %vm355_vm1 = vcmask 1043456   ;;  %vm351_vm2 = vcmask 31744   ;;  %v339_v3 = vld [vmem:[%s1562_s3] sm:$0xff] }
   0xc   : > { %1316 = vmatprep.subr.mxu0 %v1386_v0  ;;  %1321 = vmatprep.subr.mxu1 %v1386_v0  ;;  %s1445_s26 = sshll.u32 %s1568_s25, 3  ;;  %v1275_v7 = vld [vmem:[%s1562_s3 + $0x18] sm:$0xff]  ;;  %v1390_v10 = vmov 0   ;;  %v1095_v12 = vld [vmem:[%s1563_s4] sm:$0xff]  ;;  %vm349_vm3 = vcmask 982016   ;;  %vm513_vm4 = vcmask 916480  }
   0xd   : > { %1318 = vmatprep.mubr.msk.f32.mxu0 %vm1387_vm0, %v1386_v0  ;;  %1323 = vmatprep.mubr.msk.f32.mxu1 %vm1387_vm0, %v1386_v0  ;;  %s315_s29 = scalar_lea.vmem %s1559_s0, %s1445_s26  ;;  %s320_s9 = scalar_lea.vmem %s1560_s1, %s1445_s26  ;;  %v1267_v17 = vld [vmem:[%s1562_s3 + $0x8] sm:$0xff]  ;;  %v1272_v22 = vld [vmem:[%s1562_s3 + $0x10] sm:$0xff]  ;;  %v1278_v26 = vld [vmem:[%s1562_s3 + $0x20] sm:$0xff]  ;;  %vm1108_vm5 = vcmask 7168  }
   0xe   : > { %v504_v1 = vld [vmem:[%s315_s29] sm:$0xff]  ;;  %s1474_s18 = scalar_lea.vmem %s1561_s2, %s1445_s26  ;;  %1374 = vset.pattern.permute.xlu0 %v1390_v10  ;;  %v1281_v27 = vld [vmem:[%s1562_s3 + $0x28] sm:$0xff]  ;;  %v1284_v32 = vld [vmem:[%s1562_s3 + $0x30] sm:$0xff]  ;;  %s329_s16 = scalar_lea.vmem %s1564_s5, %s1445_s26 }
   0xf   : > { %v338_v2 = vld [vmem:[%s315_s29] sm:$0xf]  ;;  %509 = vrot.lane.b32.xlu1 %v504_v1, %s1388_s12  ;;  %v508_v4 = vcombine.high %v504_v1, %v504_v1  ;;  %345 = vrot.lane.b32.xlu0 %v504_v1, %s1389_s13  ;;  %v1287_v33 = vld [vmem:[%s1562_s3 + $0x38] sm:$0xff]  ;;  %s333_s19 = scalar_lea.vmem %s1565_s6, %s1445_s26  ;;  %s337_s22 = scalar_lea.vmem %s1566_s7, %s1445_s26 }
  0x10   : > { %v591_v5 = vld [vmem:[%s320_s9] sm:$0xf]  ;;  %1322 = vmatpush3.msk.msra.mxu1 %vm355_vm1, %v338_v2 }
  0x11   : > { %v671_v6 = vld [vmem:[%s320_s9] sm:$0xff]  ;;  %1324 = vmatmul.mubr.msk.f32.vlgmr.msra.gmra.mxu1 %vm351_vm2, %v339_v3  ;;  %1331 = vmatprep.subr.mxu1 %v1386_v0 }
  0x12   : > { %1332 = vmatpush3.msk.msra.mxu1 %vm355_vm1, %v591_v5  ;;  %1333 = vmatprep.mubr.msk.f32.mxu1 %vm1387_vm0, %v1386_v0  ;;  %v675_v8 = vcombine.high %v671_v6, %v671_v6  ;;  %v923_v9 = vld [vmem:[%s1474_s18] sm:$0xff] }
  0x13   : > { %511 = vrot.lane.b32.xlu1 %v508_v4, %s1388_s12  ;;  %347 = vrot.lane.b32.xlu0 %v508_v4, %s1389_s13  ;;  %v927_v11 = vcombine.high %v923_v9, %v923_v9  ;;  %v843_v29 = vld [vmem:[%s1474_s18] sm:$0xf] }
  0x14   : > { %1341 = vmatprep.subr.mxu1 %v1386_v0  ;;  %v1290_v37 = vld [vmem:[%s1562_s3 + $0x40] sm:$0xff] }
  0x15   : > { %1334 = vmatmul.mubr.msk.f32.vlgmr.msra.gmra.mxu1 %vm351_vm2, %v1275_v7 }
  0x16   : > { %1343 = vmatprep.mubr.msk.f32.mxu1 %vm1387_vm0, %v1386_v0 }
  0x17   : > { %678 = vrot.lane.b32.xlu1 %v675_v8, %s1389_s13  ;;  %676 = vrot.lane.b32.xlu0 %v671_v6, %s1389_s13 }
  0x1b   : > { %764 = vrot.lane.b32.xlu1 %v675_v8, %s1388_s12  ;;  %762 = vrot.lane.b32.xlu0 %v671_v6, %s1388_s12 }
  0x1f   : > { %930 = vrot.lane.b32.xlu1 %v927_v11, %s1389_s13  ;;  %928 = vrot.lane.b32.xlu0 %v923_v9, %s1389_s13 }
  0x23   : > { %1016 = vrot.lane.b32.xlu1 %v927_v11, %s1388_s12  ;;  %1014 = vrot.lane.b32.xlu0 %v923_v9, %s1388_s12 }
  0x27   : > { %1098 = vperm.xlu0 %1374, %v1095_v12  }
  0x81   : > { %v510_v13 = vpop.permute.xlu1 %509  ;;  %v346_v14 = vpop.permute.xlu0 %345 }
  0x85   : > { %v512_v15 = vpop.permute.xlu1 %511  ;;  %v348_v16 = vpop.permute.xlu0 %347 }
  0x86   : > { %v350_v18 = vsel %vm349_vm3, %v346_v14, %v348_v16  ;;  %v514_v19 = vsel %vm513_vm4, %v510_v13, %v512_v15 }
  0x87   : > { %1317 = vmatpush3.msk.msra.mxu0 %vm355_vm1, %v350_v18 }
  0x88   : > { %1319 = vmatmul.mubr.msk.f32.vlgmr.msra.gmra.mxu0 %vm351_vm2, %v1267_v17  ;;  %1326 = vmatprep.subr.mxu0 %v1386_v0 }
  0x89   : > { %v679_v20 = vpop.permute.xlu1 %678  ;;  %1327 = vmatpush3.msk.msra.mxu0 %vm355_vm1, %v514_v19  ;;  %v677_v21 = vpop.permute.xlu0 %676  ;;  %1328 = vmatprep.mubr.msk.f32.mxu0 %vm1387_vm0, %v1386_v0 }
  0x8a   : > { %v680_v23 = vsel %vm349_vm3, %v677_v21, %v679_v20  ;;  %1336 = vmatprep.subr.mxu0 %v1386_v0 }
  0x8c   : > { %1329 = vmatmul.mubr.msk.f32.vlgmr.msra.gmra.mxu0 %vm351_vm2, %v1272_v22 }
  0x8d   : > { %1337 = vmatpush3.msk.msra.mxu0 %vm355_vm1, %v680_v23  ;;  %v765_v24 = vpop.permute.xlu1 %764  ;;  %v763_v25 = vpop.permute.xlu0 %762  ;;  %1338 = vmatprep.mubr.msk.f32.mxu0 %vm1387_vm0, %v1386_v0 }
  0x8e   : > { %v766_v28 = vsel %vm513_vm4, %v763_v25, %v765_v24  ;;  %1346 = vmatprep.subr.mxu0 %v1386_v0 }
  0x8f   : > { %1342 = vmatpush3.msk.msra.mxu1 %vm355_vm1, %v766_v28 }
  0x90   : > { %1339 = vmatmul.mubr.msk.f32.vlgmr.msra.gmra.mxu0 %vm351_vm2, %v1278_v26  ;;  %1344 = vmatmul.mubr.msk.f32.vlgmr.msra.gmra.mxu1 %vm351_vm2, %v1281_v27 }
  0x91   : > { %v931_v30 = vpop.permute.xlu1 %930  ;;  %v929_v31 = vpop.permute.xlu0 %928  ;;  %1351 = vmatprep.subr.mxu1 %v1386_v0  ;;  %1347 = vmatpush3.msk.msra.mxu0 %vm355_vm1, %v843_v29 }
  0x92   : > { %v932_v34 = vsel %vm349_vm3, %v929_v31, %v931_v30  ;;  %1348 = vmatprep.mubr.msk.f32.mxu0 %vm1387_vm0, %v1386_v0  ;;  %1353 = vmatprep.mubr.msk.f32.mxu1 %vm1387_vm0, %v1386_v0 }
  0x93   : > { %1352 = vmatpush3.msk.msra.mxu1 %vm355_vm1, %v932_v34  ;;  %1356 = vmatprep.subr.mxu0 %v1386_v0 }
  0x94   : > { %1349 = vmatmul.mubr.msk.f32.vlgmr.msra.gmra.mxu0 %vm351_vm2, %v1284_v32  ;;  %1354 = vmatmul.mubr.msk.f32.vlgmr.msra.gmra.mxu1 %vm351_vm2, %v1287_v33 }
  0x95   : > { %v1017_v35 = vpop.permute.xlu1 %1016  ;;  %v1015_v36 = vpop.permute.xlu0 %1014  ;;  %1358 = vmatprep.mubr.msk.f32.mxu0 %vm1387_vm0, %v1386_v0 }
  0x96   : > { %v1018_v38 = vsel %vm513_vm4, %v1015_v36, %v1017_v35 }
  0x97   : > { %1357 = vmatpush3.msk.msra.mxu0 %vm355_vm1, %v1018_v38 }
  0x98   : > { %1359 = vmatmul.mubr.msk.f32.vlgmr.msra.gmra.mxu0 %vm351_vm2, %v1290_v37 }
  0xa2   : > { %v1099_v63 = vpop.permute.xlu0 %1098 }
  0xd1   : > { %v500_v39 = vpop.f32.mrf.mxu1 }
  0xd3   : > { %v1325_v40 = vpop.f32.mrf.mxu1 }
  0xd5   : > { %v666_v41 = vpop.f32.mrf.mxu1 }
  0xd7   : > { %v1335_v42 = vpop.f32.mrf.mxu1 }
 0x148   : > { %v424_v43 = vpop.f32.mrf.mxu0 }
 0x149   : > { %v501_v45 = vadd.f32 %v500_v39, %v424_v43 }
 0x14a   : > { %v1320_v44 = vpop.f32.mrf.mxu0 }
 0x14c   : > { %v586_v46 = vpop.f32.mrf.mxu0 }
 0x14d   : > { %v590_v47 = vadd.f32 %v586_v46, %v501_v45 }
 0x14e   : > { %v1330_v48 = vpop.f32.mrf.mxu0 }
 0x14f   : > { %v670_v49 = vadd.f32 %v666_v41, %v590_v47 }
 0x150   : > { %v752_v50 = vpop.f32.mrf.mxu0  ;;  %v838_v51 = vpop.f32.mrf.mxu1 }
 0x151   : > { %v756_v52 = vadd.f32 %v752_v50, %v670_v49 }
 0x152   : > { %v1340_v53 = vpop.f32.mrf.mxu0  ;;  %v1345_v54 = vpop.f32.mrf.mxu1 }
 0x153   : > { %v842_v55 = vadd.f32 %v838_v51, %v756_v52 }
 0x154   : > { %v918_v56 = vpop.f32.mrf.mxu0  ;;  %v1004_v57 = vpop.f32.mrf.mxu1 }
 0x155   : > { %v922_v58 = vadd.f32 %v918_v56, %v842_v55 }
 0x156   : > { %v1350_v59 = vpop.f32.mrf.mxu0  ;;  %v1355_v60 = vpop.f32.mrf.mxu1 }
 0x157   : > { %v1008_v61 = vadd.f32 %v1004_v57, %v922_v58 }
 0x158   : > { %v1090_v62 = vpop.f32.mrf.mxu0 }
 0x159   : > { %v1094_v0 = vadd.f32 %v1090_v62, %v1008_v61 }
 0x15a   : > { %v1360_v1 = vpop.f32.mrf.mxu0 }
 0x15b   : > { %v1101_v2 = vadd.f32 %v1099_v63, %v1094_v0 }
 0x15d   : > { %v1102_v3 = vmax.f32 %v1101_v2, 0.0 }
 0x15f   : > { %1103 = vst [vmem:[%s329_s16] sm:$0xff] %v1102_v3  ;;  %1104 = vadd.xlane.f32.xlu1 %v1102_v3 }
 0x1e8   : > { %v1105_v4 = vpop.xlane.xlu1 %1104 }
 0x1e9   : > { %v1106_v5 = vmul.f32 0.0078125, %v1105_v4  ;;  %1109 = vst.msk [vmem:[%s333_s19] sm:$0xff] %vm1108_vm5, %v1105_v4 }
 0x1eb   : > { %v1107_v6 = vsub.f32 %v1102_v3, %v1106_v5 }
 0x1ed   : > { %v1110_v7 = vmul.f32 %v1107_v6, %v1107_v6 }
 0x1ef   : > { %1111 = vadd.xlane.f32.xlu0 %v1110_v7 }
 0x278   : > { %v1112_v8 = vpop.xlane.xlu0 %1111 }
 0x279   : > { %1113 = vst.msk [vmem:[%s337_s22] sm:$0xff] %vm1108_vm5, %v1112_v8 }
 0x27a PF: > { %s18_s24 = sadd.s32 1, %s1384_s24  }
 0x27b   : > { %p15_p4 = scmp.ge.s32.totalorder %s18_s24, 4  }
 0x27d   :  { %17 = sbr.rel (!%p15_p4) target bundleno = 1 (0x1), region = 108 }

</bundles_post_ra>
